<compile_context>
chip_gen: v7x
topology: tpu7x:2x2x1
jax: 0.10.0
libtpu: 0.0.40
codegen_flags: <defaults>
</compile_context>

<pallas_src>
import functools

import jax
import jax.numpy as jnp
from jax import lax
from jax.experimental import pallas as pl
from jax.experimental.pallas import tpu as pltpu


_SQRT_2_OVER_PI = 0.7978845608028654
_MASK_NEG = -1e30   # large finite negative: exp underflows to exactly 0, never NaN


def _gelu_tanh(x):
    return 0.5 * x * (1.0 + jnp.tanh(_SQRT_2_OVER_PI * (x + 0.044715 * (x * x * x))))


# --------------------------------------------------------------------------- #
# Fused whole-stack kernel: one grid step = (batch row, encoder layer)
# --------------------------------------------------------------------------- #
def _tst_encoder_kernel(src_ref, wqkv_ref, wo_ref, w1_ref, w2_ref,
                        vecs_ref, b1_ref, out_ref, *, n_heads, h_win_size):
    layer = pl.program_id(1)

    # Layer 0 seeds the resident activation; the output block keeps the same
    # block index across the whole "arbitrary" layer axis so it stays in VMEM.
    @pl.when(layer == 0)
    def _():
        out_ref[...] = src_ref[...]

    x = out_ref[0]                                    # (q_len, d_model) f32
    q_len, d_model = x.shape
    d_k = d_model // n_heads

    wqkv = wqkv_ref[0]                                # (d_model, 3*d_model)
    wo = wo_ref[0]                                    # (d_model, d_model)
    w1 = w1_ref[0]                                    # (d_model, d_ff)
    w2 = w2_ref[0]                                    # (d_ff, d_model)
    vecs = vecs_ref[0]                                # (9, d_model) packed vectors
    b1 = b1_ref[0]                                    # (1, d_ff)

    bq, bk, bv = vecs[0:1, :], vecs[1:2, :], vecs[2:3, :]
    bo = vecs[3:4, :]
    bn1_s, bn1_b = vecs[4:5, :], vecs[5:6, :]
    b2 = vecs[6:7, :]
    bn2_s, bn2_b = vecs[7:8, :], vecs[8:9, :]

    # --- fused QKV projection (softmax scale pre-folded into Q weight/bias) ---
    qkv = jnp.dot(x, wqkv, preferred_element_type=jnp.float32)
    q = qkv[:, :d_model] + bq
    k = qkv[:, d_model:2 * d_model] + bk
    v = qkv[:, 2 * d_model:] + bv

    # --- additive locality mask, built once per step (shared by all heads) ---
    row = lax.broadcasted_iota(jnp.int32, (q_len, q_len), 0)
    col = lax.broadcasted_iota(jnp.int32, (q_len, q_len), 1)
    mask_add = jnp.where(jnp.abs(row - col) < h_win_size,
                         jnp.float32(_MASK_NEG), jnp.float32(0.0))

    # --- per-head SDPA with W_O accumulated in the loop (no lane concat) ---
    attn_out = jnp.zeros((q_len, d_model), jnp.float32)
    for h in range(n_heads):                          # n_heads small: static unroll
        lo, hi = h * d_k, (h + 1) * d_k
        qh, kh, vh = q[:, lo:hi], k[:, lo:hi], v[:, lo:hi]

        s = jnp.einsum("qd,kd->qk", qh, kh,
                       preferred_element_type=jnp.float32) + mask_add
        m = jnp.max(s, axis=-1, keepdims=True)
        e = jnp.exp(s - m)
        w = e / jnp.sum(e, axis=-1, keepdims=True)    # exact divide (tiny rows)

        oh = jnp.dot(w, vh, preferred_element_type=jnp.float32)         # (q_len, d_k)
        attn_out = attn_out + jnp.dot(oh, wo[lo:hi, :],
                                      preferred_element_type=jnp.float32)

    attn_out = attn_out + bo

    # --- residual + BatchNorm (eval-mode per-channel affine) ---
    y = (x + attn_out) * bn1_s + bn1_b

    # --- feed-forward: Linear -> GELU(tanh) -> Linear, residual + BatchNorm ---
    h1 = _gelu_tanh(jnp.dot(y, w1, preferred_element_type=jnp.float32) + b1)
    h2 = jnp.dot(h1, w2, preferred_element_type=jnp.float32) + b2

    out_ref[0] = ((y + h2) * bn2_s + bn2_b).astype(out_ref.dtype)


# --------------------------------------------------------------------------- #
# Wrapper: parameter stacking/folding + pallas_call
# --------------------------------------------------------------------------- #
def _stack_layer_params(layer_params, d_model, n_heads):
    """Stack per-layer params with a leading layer dim; fold the softmax scale
    into the Q columns of the fused QKV weight/bias; pack small vectors."""
    d_k = d_model // n_heads
    scale = float(d_k) ** (-0.5)                      # head_dim ** -0.5 (lsa=False)

    wqkv_l, wo_l, w1_l, w2_l, vecs_l, b1_l = [], [], [], [], [], []
    for p in layer_params:
        wqkv = p["wqkv"].at[:, :d_model].multiply(scale)
        bqkv = p["bqkv"][0]
        bq = bqkv[:d_model] * scale
        bk = bqkv[d_model:2 * d_model]
        bv = bqkv[2 * d_model:]
        vecs = jnp.stack([bq, bk, bv, p["bo"][0],
                          p["bn1_scale"][0], p["bn1_shift"][0],
                          p["b2"][0],
                          p["bn2_scale"][0], p["bn2_shift"][0]], axis=0)
        wqkv_l.append(wqkv); wo_l.append(p["wo"])
        w1_l.append(p["w1"]); w2_l.append(p["w2"])
        vecs_l.append(vecs); b1_l.append(p["b1"])

    return (jnp.stack(wqkv_l), jnp.stack(wo_l), jnp.stack(w1_l),
            jnp.stack(w2_l), jnp.stack(vecs_l), jnp.stack(b1_l))


def tst_encoder_forward(src, layer_params, *, n_heads, local_ws):
    """TSTEncoder.forward (res_attention=False, post-norm, BatchNorm eval,
    dropout=0): the full layer stack fused into a single pallas_call."""
    assert local_ws % 2 == 1, "The window size is assumed to be odd"
    bs, q_len, d_model = src.shape
    n_layers = len(layer_params)
    d_ff = layer_params[0]["w1"].shape[1]
    h_win_size = local_ws // 2 + 1

    wqkv, wo, w1, w2, vecs, b1 = _stack_layer_params(layer_params, d_model, n_heads)

    kernel = functools.partial(_tst_encoder_kernel,
                               n_heads=n_heads, h_win_size=h_win_size)

    in_specs = [
        pl.BlockSpec((1, q_len, d_model), lambda b, l: (b, 0, 0)),        # src
        pl.BlockSpec((1, d_model, 3 * d_model), lambda b, l: (l, 0, 0)),  # wqkv
        pl.BlockSpec((1, d_model, d_model), lambda b, l: (l, 0, 0)),      # wo
        pl.BlockSpec((1, d_model, d_ff), lambda b, l: (l, 0, 0)),         # w1
        pl.BlockSpec((1, d_ff, d_model), lambda b, l: (l, 0, 0)),         # w2
        pl.BlockSpec((1, 9, d_model), lambda b, l: (l, 0, 0)),            # packed vecs
        pl.BlockSpec((1, 1, d_ff), lambda b, l: (l, 0, 0)),               # b1
    ]
    # Same block index across the layer axis -> resident inter-layer activation.
    out_spec = pl.BlockSpec((1, q_len, d_model), lambda b, l: (b, 0, 0))

    return pl.pallas_call(
        kernel,
        out_shape=jax.ShapeDtypeStruct((bs, q_len, d_model), jnp.float32),
        grid_spec=pltpu.PrefetchScalarGridSpec(
            num_scalar_prefetch=0,
            grid=(bs, n_layers),                       # batch parallel, layers serial
            in_specs=in_specs,
            out_specs=out_spec,
        ),
        compiler_params=pltpu.CompilerParams(
            dimension_semantics=("parallel", "arbitrary")),
    )(src, wqkv, wo, w1, w2, vecs, b1)


# --------------------------------------------------------------------------- #
# Parameter construction (deterministic, PyTorch-Linear-like init; BatchNorm
# at fresh-module defaults folded to an eval-mode affine).
# --------------------------------------------------------------------------- #
def init_layer_params(key, d_model, n_heads, d_ff):
    del n_heads  # d_k = d_v = d_model // n_heads is implicit in the fused weights
    ks = jax.random.split(key, 4)

    def linear(k, fan_in, fan_out):
        kw, kb = jax.random.split(k)
        lim = float(fan_in) ** (-0.5)
        w = jax.random.uniform(kw, (fan_in, fan_out), jnp.float32, -lim, lim)
        b = jax.random.uniform(kb, (1, fan_out), jnp.float32, -lim, lim)
        return w, b

    wqkv, bqkv = linear(ks[0], d_model, 3 * d_model)   # W_Q | W_K | W_V fused
    wo, bo = linear(ks[1], d_model, d_model)           # to_out Linear
    w1, b1 = linear(ks[2], d_model, d_ff)              # ff Linear 1
    w2, b2 = linear(ks[3], d_ff, d_model)              # ff Linear 2

    # BatchNorm1d(d_model) eval-mode at defaults: gamma=1, beta=0, mean=0, var=1
    eps = 1e-5
    gamma = jnp.ones((d_model,), jnp.float32)
    beta = jnp.zeros((d_model,), jnp.float32)
    rmean = jnp.zeros((d_model,), jnp.float32)
    rvar = jnp.ones((d_model,), jnp.float32)
    bn_scale = (gamma / jnp.sqrt(rvar + eps)).reshape(1, d_model)
    bn_shift = (beta - rmean * gamma / jnp.sqrt(rvar + eps)).reshape(1, d_model)

    return dict(wqkv=wqkv, bqkv=bqkv, wo=wo, bo=bo,
                bn1_scale=bn_scale, bn1_shift=bn_shift,
                w1=w1, b1=b1, w2=w2, b2=b2,
                bn2_scale=bn_scale, bn2_shift=bn_shift)


# --------------------------------------------------------------------------- #
# Plain-JAX reference (high-precision matmuls) for validation
# --------------------------------------------------------------------------- #
def _reference_forward(src, layer_params, *, n_heads, local_ws):
    hi = jax.lax.Precision.HIGHEST

    def mm(a, b):
        return jnp.matmul(a, b, precision=hi)

    x = src
    for p in layer_params:
        bs, q_len, d_model = x.shape
        d_k = d_model // n_heads
        scale = float(d_k) ** (-0.5)
        h_win = local_ws // 2 + 1

        qkv = mm(x, p["wqkv"]) + p["bqkv"]
        q, k, v = jnp.split(qkv, 3, axis=-1)

        def heads(t):
            return t.reshape(bs, q_len, n_heads, d_k).transpose(0, 2, 1, 3)

        qh, kh, vh = heads(q), heads(k), heads(v)
        s = jnp.einsum("bhqd,bhkd->bhqk", qh, kh, precision=hi) * scale
        i = jnp.arange(q_len)[:, None]
        j = jnp.arange(q_len)[None, :]
        s = jnp.where((jnp.abs(i - j) < h_win)[None, None], -jnp.inf, s)
        w = jax.nn.softmax(s, axis=-1)
        o = jnp.einsum("bhqk,bhkd->bhqd", w, vh, precision=hi)
        o = o.transpose(0, 2, 1, 3).reshape(bs, q_len, d_model)
        o = mm(o, p["wo"]) + p["bo"]

        y = (x + o) * p["bn1_scale"] + p["bn1_shift"]
        h1 = _gelu_tanh(mm(y, p["w1"]) + p["b1"])
        h2 = mm(h1, p["w2"]) + p["b2"]
        x = (y + h2) * p["bn2_scale"] + p["bn2_shift"]
    return x


if __name__ == "__main__":
    # Small shapes implied by the module: d_model=32, n_heads=4 (head_dim=8),
    # bs=2, q_len=seq_len=8, locality window 3, d_ff=128, 2 encoder layers.
    bs, q_len, d_model, n_heads = 2, 8, 32, 4
    d_ff, local_ws, n_layers = 128, 3, 2

    key = jax.random.PRNGKey(0)
    k_src, k_par = jax.random.split(key)
    src = jax.random.normal(k_src, (bs, q_len, d_model), dtype=jnp.float32)
    layer_keys = jax.random.split(k_par, n_layers)
    layer_params = [init_layer_params(k, d_model, n_heads, d_ff) for k in layer_keys]

    fwd = jax.jit(functools.partial(tst_encoder_forward,
                                    n_heads=n_heads, local_ws=local_ws))
    out = jax.block_until_ready(fwd(src, layer_params))

    ref = _reference_forward(src, layer_params, n_heads=n_heads, local_ws=local_ws)

    assert out.shape == (bs, q_len, d_model)
    assert jnp.allclose(out, ref, atol=5e-3, rtol=5e-3), \
        float(jnp.max(jnp.abs(out - ref)))

    print("KERNEL_OK")
</pallas_src>

<mosaic_0001>
module attributes {stable_mosaic.version = 11 : i64} {
  func.func @_tst_encoder_kernel(%arg0: i32, %arg1: i32, %arg2: memref<1x8x32xf32, #tpu.memory_space<vmem>>, %arg3: memref<1x32x96xf32, #tpu.memory_space<vmem>>, %arg4: memref<1x32x32xf32, #tpu.memory_space<vmem>>, %arg5: memref<1x32x128xf32, #tpu.memory_space<vmem>>, %arg6: memref<1x128x32xf32, #tpu.memory_space<vmem>>, %arg7: memref<1x9x32xf32, #tpu.memory_space<vmem>>, %arg8: memref<1x1x128xf32, #tpu.memory_space<vmem>>, %arg9: memref<1x8x32xf32, #tpu.memory_space<vmem>>) attributes {dimension_semantics = [#tpu.dimension_semantics<parallel>, #tpu.dimension_semantics<arbitrary>], iteration_bounds = array<i64: 2, 2>, scalar_prefetch = 0 : i64, scratch_operands = 0 : i64, tpu.core_type = #tpu.core_type<tc>, window_params = [{transform_indices = @transform_0, window_bounds = array<i64: 1, 8, 32>}, {transform_indices = @transform_1, window_bounds = array<i64: 1, 32, 96>}, {transform_indices = @transform_2, window_bounds = array<i64: 1, 32, 32>}, {transform_indices = @transform_3, window_bounds = array<i64: 1, 32, 128>}, {transform_indices = @transform_4, window_bounds = array<i64: 1, 128, 32>}, {transform_indices = @transform_5, window_bounds = array<i64: 1, 9, 32>}, {transform_indices = @transform_6, window_bounds = array<i64: 1, 1, 128>}, {transform_indices = @transform_7, window_bounds = array<i64: 1, 8, 32>}]} {
    %c0_i32 = arith.constant 0 : i32
    %0 = arith.cmpi eq, %arg1, %c0_i32 : i32
    %1 = arith.extui %0 : i1 to i32
    %c0_i32_0 = arith.constant 0 : i32
    %2 = arith.cmpi ne, %1, %c0_i32_0 : i32
    scf.if %2 {
      %c0_53 = arith.constant 0 : index
      %c0_54 = arith.constant 0 : index
      %c0_55 = arith.constant 0 : index
      %152 = vector.load %arg2[%c0_53, %c0_54, %c0_55] : memref<1x8x32xf32, #tpu.memory_space<vmem>>, vector<1x8x32xf32>
      %c0_56 = arith.constant 0 : index
      %c0_57 = arith.constant 0 : index
      %c0_58 = arith.constant 0 : index
      %153 = vector.load %arg9[%c0_56, %c0_57, %c0_58] : memref<1x8x32xf32, #tpu.memory_space<vmem>>, vector<1x8x32xf32>
      tpu.vector_store %arg9[%c0_56, %c0_57, %c0_58], %152 {strides = array<i32>} : memref<1x8x32xf32, #tpu.memory_space<vmem>>, vector<1x8x32xf32>,
    } else {
    }
    %c0 = arith.constant 0 : index
    %c0_1 = arith.constant 0 : index
    %c0_2 = arith.constant 0 : index
    %3 = vector.load %arg9[%c0, %c0_1, %c0_2] : memref<1x8x32xf32, #tpu.memory_space<vmem>>, vector<1x8x32xf32>
    %4 = vector.shape_cast %3 : vector<1x8x32xf32> to vector<8x32xf32>
    %c0_3 = arith.constant 0 : index
    %c0_4 = arith.constant 0 : index
    %c0_5 = arith.constant 0 : index
    %5 = vector.load %arg3[%c0_3, %c0_4, %c0_5] : memref<1x32x96xf32, #tpu.memory_space<vmem>>, vector<1x32x96xf32>
    %6 = vector.shape_cast %5 : vector<1x32x96xf32> to vector<32x96xf32>
    %c0_6 = arith.constant 0 : index
    %c0_7 = arith.constant 0 : index
    %c0_8 = arith.constant 0 : index
    %7 = vector.load %arg4[%c0_6, %c0_7, %c0_8] : memref<1x32x32xf32, #tpu.memory_space<vmem>>, vector<1x32x32xf32>
    %8 = vector.shape_cast %7 : vector<1x32x32xf32> to vector<32x32xf32>
    %c0_9 = arith.constant 0 : index
    %c0_10 = arith.constant 0 : index
    %c0_11 = arith.constant 0 : index
    %9 = vector.load %arg5[%c0_9, %c0_10, %c0_11] : memref<1x32x128xf32, #tpu.memory_space<vmem>>, vector<1x32x128xf32>
    %10 = vector.shape_cast %9 : vector<1x32x128xf32> to vector<32x128xf32>
    %c0_12 = arith.constant 0 : index
    %c0_13 = arith.constant 0 : index
    %c0_14 = arith.constant 0 : index
    %11 = vector.load %arg6[%c0_12, %c0_13, %c0_14] : memref<1x128x32xf32, #tpu.memory_space<vmem>>, vector<1x128x32xf32>
    %12 = vector.shape_cast %11 : vector<1x128x32xf32> to vector<128x32xf32>
    %c0_15 = arith.constant 0 : index
    %c0_16 = arith.constant 0 : index
    %c0_17 = arith.constant 0 : index
    %13 = vector.load %arg7[%c0_15, %c0_16, %c0_17] : memref<1x9x32xf32, #tpu.memory_space<vmem>>, vector<1x9x32xf32>
    %14 = vector.shape_cast %13 : vector<1x9x32xf32> to vector<9x32xf32>
    %c0_18 = arith.constant 0 : index
    %c0_19 = arith.constant 0 : index
    %c0_20 = arith.constant 0 : index
    %15 = vector.load %arg8[%c0_18, %c0_19, %c0_20] : memref<1x1x128xf32, #tpu.memory_space<vmem>>, vector<1x1x128xf32>
    %16 = vector.shape_cast %15 : vector<1x1x128xf32> to vector<1x128xf32>
    %17 = vector.extract_strided_slice %14 {offsets = [0, 0], sizes = [1, 32], strides = [1, 1]} : vector<9x32xf32> to vector<1x32xf32>
    %18 = vector.extract_strided_slice %14 {offsets = [1, 0], sizes = [1, 32], strides = [1, 1]} : vector<9x32xf32> to vector<1x32xf32>
    %19 = vector.extract_strided_slice %14 {offsets = [2, 0], sizes = [1, 32], strides = [1, 1]} : vector<9x32xf32> to vector<1x32xf32>
    %20 = vector.extract_strided_slice %14 {offsets = [3, 0], sizes = [1, 32], strides = [1, 1]} : vector<9x32xf32> to vector<1x32xf32>
    %21 = vector.extract_strided_slice %14 {offsets = [4, 0], sizes = [1, 32], strides = [1, 1]} : vector<9x32xf32> to vector<1x32xf32>
    %22 = vector.extract_strided_slice %14 {offsets = [5, 0], sizes = [1, 32], strides = [1, 1]} : vector<9x32xf32> to vector<1x32xf32>
    %23 = vector.extract_strided_slice %14 {offsets = [6, 0], sizes = [1, 32], strides = [1, 1]} : vector<9x32xf32> to vector<1x32xf32>
    %24 = vector.extract_strided_slice %14 {offsets = [7, 0], sizes = [1, 32], strides = [1, 1]} : vector<9x32xf32> to vector<1x32xf32>
    %25 = vector.extract_strided_slice %14 {offsets = [8, 0], sizes = [1, 32], strides = [1, 1]} : vector<9x32xf32> to vector<1x32xf32>
    %cst = arith.constant dense<0.000000e+00> : vector<8x96xf32>
    %26 = tpu.matmul %4, %6, %cst {dimension_numbers = #tpu.dot_dimension_numbers<[1], [0], [0], [1], [0, 0, 1, 1], [], []>} : vector<8x32xf32>, vector<32x96xf32>, vector<8x96xf32> -> vector<8x96xf32>
    %27 = vector.extract_strided_slice %26 {offsets = [0, 0], sizes = [8, 32], strides = [1, 1]} : vector<8x96xf32> to vector<8x32xf32>
    %28 = vector.broadcast %17 : vector<1x32xf32> to vector<8x32xf32>
    %29 = arith.addf %27, %28 : vector<8x32xf32>
    %30 = vector.extract_strided_slice %26 {offsets = [0, 32], sizes = [8, 32], strides = [1, 1]} : vector<8x96xf32> to vector<8x32xf32>
    %31 = vector.broadcast %18 : vector<1x32xf32> to vector<8x32xf32>
    %32 = arith.addf %30, %31 : vector<8x32xf32>
    %33 = vector.extract_strided_slice %26 {offsets = [0, 64], sizes = [8, 32], strides = [1, 1]} : vector<8x96xf32> to vector<8x32xf32>
    %34 = vector.broadcast %19 : vector<1x32xf32> to vector<8x32xf32>
    %35 = arith.addf %33, %34 : vector<8x32xf32>
    %36 = tpu.iota {dimensions = array<i32: 0>} : vector<8x8xi32>
    %37 = tpu.iota {dimensions = array<i32: 1>} : vector<8x8xi32>
    %38 = arith.subi %36, %37 : vector<8x8xi32>
    %39 = math.absi %38 : vector<8x8xi32>
    %c2_i32 = arith.constant 2 : i32
    %40 = vector.broadcast %c2_i32 : i32 to vector<8x8xi32>
    %41 = arith.cmpi slt, %39, %40 : vector<8x8xi32>
    %cst_21 = arith.constant -1.000000e+30 : f32
    %cst_22 = arith.constant 0.000000e+00 : f32
    %42 = vector.broadcast %cst_21 : f32 to vector<8x8xf32>
    %43 = vector.broadcast %cst_22 : f32 to vector<8x8xf32>
    %44 = arith.select %41, %42, %43 : vector<8x8xi1>, vector<8x8xf32>
    %cst_23 = arith.constant 0.000000e+00 : f32
    %45 = vector.broadcast %cst_23 : f32 to vector<8x32xf32>
    %46 = vector.extract_strided_slice %29 {offsets = [0, 0], sizes = [8, 8], strides = [1, 1]} : vector<8x32xf32> to vector<8x8xf32>
    %47 = vector.extract_strided_slice %32 {offsets = [0, 0], sizes = [8, 8], strides = [1, 1]} : vector<8x32xf32> to vector<8x8xf32>
    %48 = vector.extract_strided_slice %35 {offsets = [0, 0], sizes = [8, 8], strides = [1, 1]} : vector<8x32xf32> to vector<8x8xf32>
    "tpu.trace_start"() <{level = 10 : i32, message = "qd,kd->qk"}> : () -> ()
    %cst_24 = arith.constant dense<0.000000e+00> : vector<8x8xf32>
    %49 = tpu.matmul %46, %47, %cst_24 {dimension_numbers = #tpu.dot_dimension_numbers<[1], [1], [0], [0], [0, 0, 1, 0], [], []>} : vector<8x8xf32>, vector<8x8xf32>, vector<8x8xf32> -> vector<8x8xf32>
    "tpu.trace_stop"() : () -> ()
    %50 = arith.addf %49, %44 : vector<8x8xf32>
    %cst_25 = arith.constant dense<0xFF800000> : vector<8xf32>
    %51 = vector.multi_reduction <maximumf>, %50, %cst_25 [1] : vector<8x8xf32> to vector<8xf32>
    %52 = vector.shape_cast %51 : vector<8xf32> to vector<8x1xf32>
    %53 = vector.broadcast %52 : vector<8x1xf32> to vector<8x8xf32>
    %54 = arith.subf %50, %53 : vector<8x8xf32>
    %55 = math.exp %54 : vector<8x8xf32>
    %cst_26 = arith.constant dense<0.000000e+00> : vector<8xf32>
    %56 = vector.multi_reduction <add>, %55, %cst_26 [1] : vector<8x8xf32> to vector<8xf32>
    %57 = vector.shape_cast %56 : vector<8xf32> to vector<8x1xf32>
    %58 = vector.broadcast %57 : vector<8x1xf32> to vector<8x8xf32>
    %59 = arith.divf %55, %58 : vector<8x8xf32>
    %cst_27 = arith.constant dense<0.000000e+00> : vector<8x8xf32>
    %60 = tpu.matmul %59, %48, %cst_27 {dimension_numbers = #tpu.dot_dimension_numbers<[1], [0], [0], [1], [0, 0, 1, 1], [], []>} : vector<8x8xf32>, vector<8x8xf32>, vector<8x8xf32> -> vector<8x8xf32>
    %61 = vector.extract_strided_slice %8 {offsets = [0, 0], sizes = [8, 32], strides = [1, 1]} : vector<32x32xf32> to vector<8x32xf32>
    %cst_28 = arith.constant dense<0.000000e+00> : vector<8x32xf32>
    %62 = tpu.matmul %60, %61, %cst_28 {dimension_numbers = #tpu.dot_dimension_numbers<[1], [0], [0], [1], [0, 0, 1, 1], [], []>} : vector<8x8xf32>, vector<8x32xf32>, vector<8x32xf32> -> vector<8x32xf32>
    %63 = arith.addf %45, %62 : vector<8x32xf32>
    %64 = vector.extract_strided_slice %29 {offsets = [0, 8], sizes = [8, 8], strides = [1, 1]} : vector<8x32xf32> to vector<8x8xf32>
    %65 = vector.extract_strided_slice %32 {offsets = [0, 8], sizes = [8, 8], strides = [1, 1]} : vector<8x32xf32> to vector<8x8xf32>
    %66 = vector.extract_strided_slice %35 {offsets = [0, 8], sizes = [8, 8], strides = [1, 1]} : vector<8x32xf32> to vector<8x8xf32>
    "tpu.trace_start"() <{level = 10 : i32, message = "qd,kd->qk"}> : () -> ()
    %cst_29 = arith.constant dense<0.000000e+00> : vector<8x8xf32>
    %67 = tpu.matmul %64, %65, %cst_29 {dimension_numbers = #tpu.dot_dimension_numbers<[1], [1], [0], [0], [0, 0, 1, 0], [], []>} : vector<8x8xf32>, vector<8x8xf32>, vector<8x8xf32> -> vector<8x8xf32>
    "tpu.trace_stop"() : () -> ()
    %68 = arith.addf %67, %44 : vector<8x8xf32>
    %cst_30 = arith.constant dense<0xFF800000> : vector<8xf32>
    %69 = vector.multi_reduction <maximumf>, %68, %cst_30 [1] : vector<8x8xf32> to vector<8xf32>
    %70 = vector.shape_cast %69 : vector<8xf32> to vector<8x1xf32>
    %71 = vector.broadcast %70 : vector<8x1xf32> to vector<8x8xf32>
    %72 = arith.subf %68, %71 : vector<8x8xf32>
    %73 = math.exp %72 : vector<8x8xf32>
    %cst_31 = arith.constant dense<0.000000e+00> : vector<8xf32>
    %74 = vector.multi_reduction <add>, %73, %cst_31 [1] : vector<8x8xf32> to vector<8xf32>
    %75 = vector.shape_cast %74 : vector<8xf32> to vector<8x1xf32>
    %76 = vector.broadcast %75 : vector<8x1xf32> to vector<8x8xf32>
    %77 = arith.divf %73, %76 : vector<8x8xf32>
    %cst_32 = arith.constant dense<0.000000e+00> : vector<8x8xf32>
    %78 = tpu.matmul %77, %66, %cst_32 {dimension_numbers = #tpu.dot_dimension_numbers<[1], [0], [0], [1], [0, 0, 1, 1], [], []>} : vector<8x8xf32>, vector<8x8xf32>, vector<8x8xf32> -> vector<8x8xf32>
    %79 = vector.extract_strided_slice %8 {offsets = [8, 0], sizes = [8, 32], strides = [1, 1]} : vector<32x32xf32> to vector<8x32xf32>
    %cst_33 = arith.constant dense<0.000000e+00> : vector<8x32xf32>
    %80 = tpu.matmul %78, %79, %cst_33 {dimension_numbers = #tpu.dot_dimension_numbers<[1], [0], [0], [1], [0, 0, 1, 1], [], []>} : vector<8x8xf32>, vector<8x32xf32>, vector<8x32xf32> -> vector<8x32xf32>
    %81 = arith.addf %63, %80 : vector<8x32xf32>
    %82 = vector.extract_strided_slice %29 {offsets = [0, 16], sizes = [8, 8], strides = [1, 1]} : vector<8x32xf32> to vector<8x8xf32>
    %83 = vector.extract_strided_slice %32 {offsets = [0, 16], sizes = [8, 8], strides = [1, 1]} : vector<8x32xf32> to vector<8x8xf32>
    %84 = vector.extract_strided_slice %35 {offsets = [0, 16], sizes = [8, 8], strides = [1, 1]} : vector<8x32xf32> to vector<8x8xf32>
    "tpu.trace_start"() <{level = 10 : i32, message = "qd,kd->qk"}> : () -> ()
    %cst_34 = arith.constant dense<0.000000e+00> : vector<8x8xf32>
    %85 = tpu.matmul %82, %83, %cst_34 {dimension_numbers = #tpu.dot_dimension_numbers<[1], [1], [0], [0], [0, 0, 1, 0], [], []>} : vector<8x8xf32>, vector<8x8xf32>, vector<8x8xf32> -> vector<8x8xf32>
    "tpu.trace_stop"() : () -> ()
    %86 = arith.addf %85, %44 : vector<8x8xf32>
    %cst_35 = arith.constant dense<0xFF800000> : vector<8xf32>
    %87 = vector.multi_reduction <maximumf>, %86, %cst_35 [1] : vector<8x8xf32> to vector<8xf32>
    %88 = vector.shape_cast %87 : vector<8xf32> to vector<8x1xf32>
    %89 = vector.broadcast %88 : vector<8x1xf32> to vector<8x8xf32>
    %90 = arith.subf %86, %89 : vector<8x8xf32>
    %91 = math.exp %90 : vector<8x8xf32>
    %cst_36 = arith.constant dense<0.000000e+00> : vector<8xf32>
    %92 = vector.multi_reduction <add>, %91, %cst_36 [1] : vector<8x8xf32> to vector<8xf32>
    %93 = vector.shape_cast %92 : vector<8xf32> to vector<8x1xf32>
    %94 = vector.broadcast %93 : vector<8x1xf32> to vector<8x8xf32>
    %95 = arith.divf %91, %94 : vector<8x8xf32>
    %cst_37 = arith.constant dense<0.000000e+00> : vector<8x8xf32>
    %96 = tpu.matmul %95, %84, %cst_37 {dimension_numbers = #tpu.dot_dimension_numbers<[1], [0], [0], [1], [0, 0, 1, 1], [], []>} : vector<8x8xf32>, vector<8x8xf32>, vector<8x8xf32> -> vector<8x8xf32>
    %97 = vector.extract_strided_slice %8 {offsets = [16, 0], sizes = [8, 32], strides = [1, 1]} : vector<32x32xf32> to vector<8x32xf32>
    %cst_38 = arith.constant dense<0.000000e+00> : vector<8x32xf32>
    %98 = tpu.matmul %96, %97, %cst_38 {dimension_numbers = #tpu.dot_dimension_numbers<[1], [0], [0], [1], [0, 0, 1, 1], [], []>} : vector<8x8xf32>, vector<8x32xf32>, vector<8x32xf32> -> vector<8x32xf32>
    %99 = arith.addf %81, %98 : vector<8x32xf32>
    %100 = vector.extract_strided_slice %29 {offsets = [0, 24], sizes = [8, 8], strides = [1, 1]} : vector<8x32xf32> to vector<8x8xf32>
    %101 = vector.extract_strided_slice %32 {offsets = [0, 24], sizes = [8, 8], strides = [1, 1]} : vector<8x32xf32> to vector<8x8xf32>
    %102 = vector.extract_strided_slice %35 {offsets = [0, 24], sizes = [8, 8], strides = [1, 1]} : vector<8x32xf32> to vector<8x8xf32>
    "tpu.trace_start"() <{level = 10 : i32, message = "qd,kd->qk"}> : () -> ()
    %cst_39 = arith.constant dense<0.000000e+00> : vector<8x8xf32>
    %103 = tpu.matmul %100, %101, %cst_39 {dimension_numbers = #tpu.dot_dimension_numbers<[1], [1], [0], [0], [0, 0, 1, 0], [], []>} : vector<8x8xf32>, vector<8x8xf32>, vector<8x8xf32> -> vector<8x8xf32>
    "tpu.trace_stop"() : () -> ()
    %104 = arith.addf %103, %44 : vector<8x8xf32>
    %cst_40 = arith.constant dense<0xFF800000> : vector<8xf32>
    %105 = vector.multi_reduction <maximumf>, %104, %cst_40 [1] : vector<8x8xf32> to vector<8xf32>
    %106 = vector.shape_cast %105 : vector<8xf32> to vector<8x1xf32>
    %107 = vector.broadcast %106 : vector<8x1xf32> to vector<8x8xf32>
    %108 = arith.subf %104, %107 : vector<8x8xf32>
    %109 = math.exp %108 : vector<8x8xf32>
    %cst_41 = arith.constant dense<0.000000e+00> : vector<8xf32>
    %110 = vector.multi_reduction <add>, %109, %cst_41 [1] : vector<8x8xf32> to vector<8xf32>
    %111 = vector.shape_cast %110 : vector<8xf32> to vector<8x1xf32>
    %112 = vector.broadcast %111 : vector<8x1xf32> to vector<8x8xf32>
    %113 = arith.divf %109, %112 : vector<8x8xf32>
    %cst_42 = arith.constant dense<0.000000e+00> : vector<8x8xf32>
    %114 = tpu.matmul %113, %102, %cst_42 {dimension_numbers = #tpu.dot_dimension_numbers<[1], [0], [0], [1], [0, 0, 1, 1], [], []>} : vector<8x8xf32>, vector<8x8xf32>, vector<8x8xf32> -> vector<8x8xf32>
    %115 = vector.extract_strided_slice %8 {offsets = [24, 0], sizes = [8, 32], strides = [1, 1]} : vector<32x32xf32> to vector<8x32xf32>
    %cst_43 = arith.constant dense<0.000000e+00> : vector<8x32xf32>
    %116 = tpu.matmul %114, %115, %cst_43 {dimension_numbers = #tpu.dot_dimension_numbers<[1], [0], [0], [1], [0, 0, 1, 1], [], []>} : vector<8x8xf32>, vector<8x32xf32>, vector<8x32xf32> -> vector<8x32xf32>
    %117 = arith.addf %99, %116 : vector<8x32xf32>
    %118 = vector.broadcast %20 : vector<1x32xf32> to vector<8x32xf32>
    %119 = arith.addf %117, %118 : vector<8x32xf32>
    %120 = arith.addf %4, %119 : vector<8x32xf32>
    %121 = vector.broadcast %21 : vector<1x32xf32> to vector<8x32xf32>
    %122 = arith.mulf %120, %121 : vector<8x32xf32>
    %123 = vector.broadcast %22 : vector<1x32xf32> to vector<8x32xf32>
    %124 = arith.addf %122, %123 : vector<8x32xf32>
    %cst_44 = arith.constant dense<0.000000e+00> : vector<8x128xf32>
    %125 = tpu.matmul %124, %10, %cst_44 {dimension_numbers = #tpu.dot_dimension_numbers<[1], [0], [0], [1], [0, 0, 1, 1], [], []>} : vector<8x32xf32>, vector<32x128xf32>, vector<8x128xf32> -> vector<8x128xf32>
    %126 = vector.broadcast %16 : vector<1x128xf32> to vector<8x128xf32>
    %127 = arith.addf %125, %126 : vector<8x128xf32>
    %cst_45 = arith.constant 5.000000e-01 : f32
    %128 = vector.broadcast %cst_45 : f32 to vector<8x128xf32>
    %129 = arith.mulf %128, %127 : vector<8x128xf32>
    %130 = arith.mulf %127, %127 : vector<8x128xf32>
    %131 = arith.mulf %130, %127 : vector<8x128xf32>
    %cst_46 = arith.constant 4.471500e-02 : f32
    %132 = vector.broadcast %cst_46 : f32 to vector<8x128xf32>
    %133 = arith.mulf %132, %131 : vector<8x128xf32>
    %134 = arith.addf %127, %133 : vector<8x128xf32>
    %cst_47 = arith.constant 0.797884583 : f32
    %135 = vector.broadcast %cst_47 : f32 to vector<8x128xf32>
    %136 = arith.mulf %135, %134 : vector<8x128xf32>
    %137 = math.tanh %136 : vector<8x128xf32>
    %cst_48 = arith.constant 1.000000e+00 : f32
    %138 = vector.broadcast %cst_48 : f32 to vector<8x128xf32>
    %139 = arith.addf %138, %137 : vector<8x128xf32>
    %140 = arith.mulf %129, %139 : vector<8x128xf32>
    %cst_49 = arith.constant dense<0.000000e+00> : vector<8x32xf32>
    %141 = tpu.matmul %140, %12, %cst_49 {dimension_numbers = #tpu.dot_dimension_numbers<[1], [0], [0], [1], [0, 0, 1, 1], [], []>} : vector<8x128xf32>, vector<128x32xf32>, vector<8x32xf32> -> vector<8x32xf32>
    %142 = vector.broadcast %23 : vector<1x32xf32> to vector<8x32xf32>
    %143 = arith.addf %141, %142 : vector<8x32xf32>
    %144 = arith.addf %124, %143 : vector<8x32xf32>
    %145 = vector.broadcast %24 : vector<1x32xf32> to vector<8x32xf32>
    %146 = arith.mulf %144, %145 : vector<8x32xf32>
    %147 = vector.broadcast %25 : vector<1x32xf32> to vector<8x32xf32>
    %148 = arith.addf %146, %147 : vector<8x32xf32>
    %c0_50 = arith.constant 0 : index
    %c0_51 = arith.constant 0 : index
    %c0_52 = arith.constant 0 : index
    %149 = vector.load %arg9[%c0_50, %c0_51, %c0_52] : memref<1x8x32xf32, #tpu.memory_space<vmem>>, vector<1x8x32xf32>
    %150 = vector.shape_cast %149 : vector<1x8x32xf32> to vector<8x32xf32>
    %151 = vector.shape_cast %148 : vector<8x32xf32> to vector<1x8x32xf32>
    tpu.vector_store %arg9[%c0_50, %c0_51, %c0_52], %151 {strides = array<i32>} : memref<1x8x32xf32, #tpu.memory_space<vmem>>, vector<1x8x32xf32>,
    return
  }
  func.func @transform_0(%arg0: i32, %arg1: i32) -> (i32, i32, i32) {
    %c0_i32 = arith.constant 0 : i32
    %c0_i32_0 = arith.constant 0 : i32
    %c0_i32_1 = arith.constant 0 : i32
    return %arg0, %c0_i32, %c0_i32_0 : i32, i32, i32
  }
  func.func @transform_1(%arg0: i32, %arg1: i32) -> (i32, i32, i32) {
    %c0_i32 = arith.constant 0 : i32
    %c0_i32_0 = arith.constant 0 : i32
    %c0_i32_1 = arith.constant 0 : i32
    return %arg1, %c0_i32, %c0_i32_0 : i32, i32, i32
  }
  func.func @transform_2(%arg0: i32, %arg1: i32) -> (i32, i32, i32) {
    %c0_i32 = arith.constant 0 : i32
    %c0_i32_0 = arith.constant 0 : i32
    %c0_i32_1 = arith.constant 0 : i32
    return %arg1, %c0_i32, %c0_i32_0 : i32, i32, i32
  }
  func.func @transform_3(%arg0: i32, %arg1: i32) -> (i32, i32, i32) {
    %c0_i32 = arith.constant 0 : i32
    %c0_i32_0 = arith.constant 0 : i32
    %c0_i32_1 = arith.constant 0 : i32
    return %arg1, %c0_i32, %c0_i32_0 : i32, i32, i32
  }
  func.func @transform_4(%arg0: i32, %arg1: i32) -> (i32, i32, i32) {
    %c0_i32 = arith.constant 0 : i32
    %c0_i32_0 = arith.constant 0 : i32
    %c0_i32_1 = arith.constant 0 : i32
    return %arg1, %c0_i32, %c0_i32_0 : i32, i32, i32
  }
  func.func @transform_5(%arg0: i32, %arg1: i32) -> (i32, i32, i32) {
    %c0_i32 = arith.constant 0 : i32
    %c0_i32_0 = arith.constant 0 : i32
    %c0_i32_1 = arith.constant 0 : i32
    return %arg1, %c0_i32, %c0_i32_0 : i32, i32, i32
  }
  func.func @transform_6(%arg0: i32, %arg1: i32) -> (i32, i32, i32) {
    %c0_i32 = arith.constant 0 : i32
    %c0_i32_0 = arith.constant 0 : i32
    %c0_i32_1 = arith.constant 0 : i32
    return %arg1, %c0_i32, %c0_i32_0 : i32, i32, i32
  }
  func.func @transform_7(%arg0: i32, %arg1: i32) -> (i32, i32, i32) {
    %c0_i32 = arith.constant 0 : i32
    %c0_i32_0 = arith.constant 0 : i32
    %c0_i32_1 = arith.constant 0 : i32
    return %arg0, %c0_i32, %c0_i32_0 : i32, i32, i32
  }
}

</mosaic_0001>

<bundles_post_ra>
// kernel: tst_encoder_forward.1
= control target key start
LH: loop header
LB: loop body
LE: loop exit
PB: predicated region body
PF: predicated region fallthrough
CT: control target
= control target key end

     0   :  { %s2692_s0 = inlined_call_operand.vmem [shape: f32[2,8,32], index: 0, kind: input, shape index: {}]   ;;  %s2693_s1 = inlined_call_operand.vmem [shape: f32[2,32,96], index: 1, kind: input, shape index: {}]   ;;  %s2694_s2 = inlined_call_operand.vmem [shape: f32[2,32,32], index: 2, kind: input, shape index: {}]   ;;  %s2695_s3 = inlined_call_operand.vmem [shape: f32[2,32,128], index: 3, kind: input, shape index: {}]   ;;  %s2696_s4 = inlined_call_operand.vmem [shape: f32[2,128,32], index: 4, kind: input, shape index: {}]   ;;  %s2697_s5 = inlined_call_operand.vmem [shape: f32[2,9,32], index: 5, kind: input, shape index: {}]   ;;  %s2698_s6 = inlined_call_operand.vmem [shape: f32[2,1,128], index: 6, kind: input, shape index: {}]   ;;  %s2699_s7 = inlined_call_operand.hbm [shape: f32[2,8,32], index: 7, kind: output, shape index: {}]  }
   0x1   :  { %2709 = sst [smem:[#allocation14_spill]] %s2692_s0 }
   0x2   :  { %2710 = sst [smem:[#allocation15_spill]] %s2693_s1 }
   0x3   :  { %12 = vsyncpa [#allocation3], 0 }
   0x4   :  { %14 = vsyncpa [#allocation3 + $0x1], 0  ;;  %s2353_s24 = smov 0   ;;  %s2355_s25 = smov 0  }
   0x5   :  { %s2357_s26 = smov 0   ;;  %s2359_s27 = smov 0  }
   0x6   :  { %s2361_s28 = smov 0   ;;  %s2363_s29 = smov 0  }
   0x7   :  { %s2365_s30 = smov 0   ;;  %s2367_s8 = smov 0  }
   0x8 LB: > { %2711 = sst [smem:[#allocation5_spill]] %s2267_s24  ;;  %s1845_s9 = sadd.s32 4294967295, %s2295_s8   ;;  %s2295_s8 = sphi %s2367_s8, %s20_s8   ;;  %s2291_s30 = sphi %s2365_s30, %s2733_s30   ;;  %s2287_s29 = sphi %s2363_s29, %s2732_s29   ;;  %s2283_s28 = sphi %s2361_s28, %s2731_s28   ;;  %s2279_s27 = sphi %s2359_s27, %s2730_s27   ;;  %s2275_s26 = sphi %s2357_s26, %s2729_s26   ;;  %s2271_s25 = sphi %s2355_s25, %s2735_s25   ;;  %s2267_s24 = sphi %s2353_s24, %s2734_s24  }
   0x9   : > { %2712 = sst [smem:[#allocation6_spill]] %s2275_s26  ;;  %s1846_s10 = sadd.s32 4294967294, %s2295_s8  }
   0xa   : > { %2713 = sst [smem:[#allocation7_spill]] %s2287_s29  ;;  %s29_s11 = sadd.s32 1, %s2287_s29 }
   0xb   : > { %2714 = sst [smem:[#allocation8_spill]] %s2291_s30  ;;  %p30_p0 = scmp.ge.s32.totalorder %s29_s11, 2 }
   0xc   : > { %2715 = sst [smem:[#allocation9_spill]] %s2295_s8  ;;  %s32_s12 = sadd.s32 1, %s2291_s30 }
   0xd   : > { %p231_p1 = scmp.ne.s32.totalorder %s2275_s26, %s2271_s25  ;;  %p232_p2 = scmp.eq.s32.totalorder %s1845_s9, 3 }
   0xe   : > { %s2737_s11 = smov (%p30_p0, %s29_s11), 0  ;;  %s2739_s12 = smov (!%p30_p0, %s32_s12), %s2291_s30 }
   0xf   : > { %2716 = sst [smem:[#allocation10_spill]] %s2737_s11  ;;  %p2402_p3 = por %p232_p2, %p231_p1 }
  0x10   : > { %p237_p4 = scmp.ne.s32.totalorder %s2271_s25, %s2267_s24  ;;  %p34_p5 = scmp.ge.s32.totalorder %s2739_s12, 2 }
  0x11   : > { %p238_p6 = scmp.eq.s32.totalorder %s1846_s10, 3  ;;  %p1849_p7 = scmp.ge.s32.totalorder %s2295_s8, 1 }
  0x12   : > { %p309_p8 = scmp.lt.s32.totalorder %s2295_s8, 5  ;;  %s2741_s12 = smov (%p34_p5, %s2739_s12), 0 }
  0x13   : > { %2718 = sst [smem:[#allocation11_spill]] %s2741_s12  ;;  %p2412_p9 = por %p238_p6, %p237_p4 }
  0x14   : > { %p310_p10 = pnand %p1849_p7, %p309_p8  ;;  %s218_s15 = ssub.s32 %s2291_s30, %s2741_s12 }
  0x15   : > { %s2719_s14 = scalar_select %p2412_p9, 1, 0 }
  0x16   : > { %s221_s16 = sadd.s32 1, %s2275_s26  ;;  %p219_p11 = scmp.eq.s32.totalorder %s218_s15, 0 }
  0x17   : > { %2720 = sst [smem:[#allocation12_spill]] %s2719_s14  ;;  %313 = sbr.rel (%p310_p10) target bundleno = 3625 (0xe29), region = 48 }
  0x18   : > { %s2420_s17 = scalar_select %p219_p11, %s2275_s26, %s221_s16  }
  0x19   : > { %s2702_s18 = sand.u32 (!%p310_p10), 1, %s2271_s25   ;;  %p368_p12 = scmp.lt.s32.totalorder (!%p310_p10), %s2283_s28, 1 }
  0x1a   : > { %2721 = sst [smem:[#allocation13_spill]] %s2420_s17  ;;  %s1850_s19 = sshll.u32 (!%p310_p10), %s2702_s18, 3 }
  0x1b   : > { %p372_p13 = scmp.lt.s32.totalorder (!%p310_p10), %s2279_s27, 1  ;;  %s2722_s0 = sld [smem:[#allocation14_spill]] (!%p310_p10) }
  0x1c   : > { %s2723_s1 = sld [smem:[#allocation15_spill]] (!%p310_p10)  ;;  %p1862_p0 = scmp.ne.s32.totalorder (!%p310_p10), %s2279_s27, 0 }
  0x1e   : > { %s369_s20 = scalar_select %p368_p12, %s2283_s28, 1 }
  0x1f   : > { %s2429_s21 = scalar_select %p372_p13, %s2279_s27, 1 }
  0x20   : > { %s1851_s22 = sshll.u32 %s369_s20, 3  ;;  %403 = sbr.rel (%p1862_p0) target bundleno = 40 (0x28), region = 52  ;;  %vm405_vm0 = vcmask (!%p1862_p0), 261120  }
  0x21   : > { %s371_s10 = scalar_lea.vmem %s2722_s0, %s1851_s22  ;;  %s1888_s15 = sshll.u32 %s2429_s21, 5 }
  0x22   : > { %s376_s11 = scalar_lea.vmem %s2723_s1, %s1888_s15  ;;  %s2441_s29 = scalar_lea.vmem %s2694_s2, %s1888_s15  ;;  %v404_v0 = vld [vmem:[%s371_s10] sm:$0xff] (!%p1862_p0) }
  0x23   : > { %s2446_s14 = scalar_lea.vmem %s2695_s3, %s1888_s15  ;;  %s1891_s20 = sshll.u32 %s2429_s21, 7 }
  0x24   : > { %s2452_s22 = scalar_lea.vmem %s2696_s4, %s1891_s20  ;;  %s1892_s23 = sshll.u32 %s2429_s21, 4 }
  0x25   : > { %s2458_s16 = scalar_lea.vmem %s2697_s5, %s1892_s23  ;;  %s399_s0 = scalar_lea.vmem %s2698_s6, %s2429_s21 }
  0x26   : > { %s2464_s1 = scalar_lea.vmem [#allocation2], %s1850_s19 }
  0x27   : > { %406 = vst.msk [vmem:[%s2464_s1] sm:$0xff] %vm405_vm0, %v404_v0 }
  0x28 PF: > { %v408_v1 = vld [vmem:[%s376_s11] sm:$0xff]  ;;  %v409_v2 = vld [vmem:[%s376_s11 + $0x8] sm:$0xff]  ;;  %v410_v3 = vld [vmem:[%s376_s11 + $0x10] sm:$0xff]  ;;  %v513_v4 = vlaneseq  ;;  %v2297_v5 = vmov 0.0|0.0   ;;  %vm2298_vm1 = vmmov 0   ;;  %v2299_v8 = vmov 0.0  }
  0x29   : > { %2061 = vmatprep.subr.bf16.mxu0 %v2297_v5  ;;  %v2062_v6 = vpack.c.bf16 %v409_v2, %v408_v1  ;;  %v411_v7 = vld [vmem:[%s376_s11 + $0x18] sm:$0xff]  ;;  %1952 = vmatprep.mubr.msk.f32.mxu0 %vm2298_vm1, %v2299_v8  ;;  %v2477_v11 = vld [vmem:[%s2458_s16] sm:$0xff]  ;;  %vm439_vm2 = vcmask 261120   ;;  %s2300_s24 = smov 32   ;;  %s2301_s26 = smov 96   ;;  %vm549_vm3 = vcmask 64512  }
  0x2a   : > { %v2471_v9 = vshrl.u32 %v513_v4, 7  ;;  %1980 = vmatprep.subr.mxu1 %v2299_v8  ;;  %1982 = vmatprep.mubr.msk.f32.mxu1 %vm2298_vm1, %v2299_v8  ;;  %v2065_v10 = vpack.c.bf16 %v411_v7, %v410_v3  ;;  %v539_v23 = vand.u32 127, %v513_v4  ;;  %s2302_s27 = smov 64   ;;  %s2303_s8 = smov 88   ;;  %v412_v47 = vld [vmem:[%s2441_s29] sm:$0xff]  ;;  %v413_v1 = vld [vmem:[%s2441_s29 + $0x8] sm:$0xff] }
  0x2b   : > { %2063 = vmatpush3.bf16.msra.mxu0 %v2062_v6  ;;  %s2304_s11 = smov 120   ;;  %1981 = vmatpush3.msra.mxu1 %v412_v47  ;;  %s2305_s17 = smov 56  }
  0x2c   : > { %2064 = vmatprep.subr.bf16.mxu0 %v2297_v5  ;;  %v520_v12 = vsub.s32 1, %v2471_v9  ;;  %v515_v19 = vsub.s32 0, %v2471_v9  ;;  %v540_v24 = vsub.s32 %v2471_v9, %v539_v23  ;;  %v529_v32 = vsub.s32 2, %v2471_v9  ;;  %1990 = vmatprep.subr.mxu1 %v2299_v8  ;;  %s2306_s19 = smov 80   ;;  %s2307_s10 = smov 112  }
  0x2d   : > { %s2308_s15 = smov 48   ;;  %s2309_s20 = smov 72  }
  0x2e   : > { %v521_v13 = vrot.slane %v2477_v11, %v520_v12  ;;  %v2483_v14 = vld [vmem:[%s2464_s1] sm:$0xff]  ;;  %v516_v20 = vrot.slane %v2477_v11, %v515_v19  ;;  %v542_v25 = vsub.s32 0, %v540_v24  ;;  %v530_v33 = vrot.slane %v2477_v11, %v529_v32  ;;  %s2310_s23 = smov 104   ;;  %s2311_s9 = smov 40  }
  0x2f   : > { %2066 = vmatpush3.bf16.msra.mxu0 %v2065_v10  ;;  %s1706_s21 = sshll.u32 %s2464_s1, 4  ;;  %s2724_s18 = sand.u32 1, %s2271_s25   ;;  %s2637_s21 = int_to_ptr.vmem [resolvable:$true] %s1706_s21 }
  0x30   : > { %523 = vrot.lane.b32.xlu0 %v521_v13, %s2300_s24  ;;  %1955 = vmatprep.subr.mxu0 %v2299_v8  ;;  %v1864_v26 = vmin.u32 %v542_v25, %v540_v24  ;;  %s1693_s24 = scalar_lea.sflag [#allocation3], %s2724_s18 }
  0x32   : > { %1953 = vmatmul.mubr.msk.f32.vlgmr.msra.gmra.mrb[0].mxu0 %vm439_vm2, %v2483_v14  ;;  %vm544_vm4 = vcmp.lt.s32.totalorder %v1864_v26, 2 }
  0x33   : > { %1957 = vmatprep.mubr.msk.f32.mxu0 %vm2298_vm1, %v2299_v8  ;;  %v2505_v27 = vsel %vm544_vm4, -1e+30, %v2299_v8 }
  0xa2   : > { %v524_v15 = vpop.permute.xlu0 %523 }
 0x105   : > { %v509_v16 = vpop.f32.mrb[0].mxu0 }
 0x106   : > { %v2490_v17 = vadd.f32 %v524_v15, %v509_v16  ;;  %v1954_v18 = vpop.f32.mrb[1].mxu0  ;;  %v2496_v22 = vadd.f32 %v516_v20, %v509_v16 }
 0x108   : > { %547 = vrot.lane.b32.xlu0 %v2490_v17, %s2301_s26  ;;  %s2201_s26 = scalar_lea.vmem %s2637_s21, 128 }
 0x109   : > { %p2202_p1 = scmp.ne.s32.totalorder %s2637_s21, %s2201_s26 }
 0x10b   : > { %p2203_p2 = pnand %p2202_p1, %p2402_p3 }
 0x10d   : > { %p2204_p4 = pneg %p2203_p2 }
 0x17a   : > { %v548_v21 = vpop.permute.xlu0 %547 }
 0x17b   : > { %1956 = vmatpush3.xpose.msk.msra.mxu0 %vm549_vm3, %v548_v21 }
 0x17c   : > { %1960 = vmatprep.subr.mxu0 %v2299_v8 }
 0x17e   : > { %1958 = vmatmul.mubr.msk.f32.vlgmr.msra.gmra.mrb[2].mxu0 %vm549_vm3, %v2496_v22 }
 0x17f   : > { %1962 = vmatprep.mubr.msk.f32.mxu0 %vm2298_vm1, %v2299_v8 }
 0x251   : > { %v621_v28 = vpop.f32.mrb[2].mxu0 }
 0x252   : > { %v622_v29 = vadd.f32 %v621_v28, %v2505_v27  ;;  %v1959_v30 = vpop.f32.mrb[3].mxu0 }
 0x253   : > { %v414_v30 = vld [vmem:[%s2441_s29 + $0x10] sm:$0xff] }
 0x254   : > { %v625_v31 = vsel %vm549_vm3, %v622_v29, -inf }
 0x255   : > { %626 = vmax.xlane.f32.xlu1 %v625_v31 }
 0x266   : > { %532 = vrot.lane.b32.xlu1 %v530_v33, %s2302_s27 }
 0x2e2   : > { %v627_v34 = vpop.xlane.xlu1 %626 }
 0x2e3   : > { %v628_v35 = vsub.f32 %v622_v29, %v627_v34 }
 0x2e5   : > { %v629_v36 = vmul.f32 1.442695, %v628_v35 }
 0x2e6   : > { %v533_v37 = vpop.permute.xlu1 %532 }
 0x2e7   : > { %2183 = vpow2.f32 %v629_v36  ;;  %v2511_v38 = vadd.f32 %v533_v37, %v509_v16 }
 0x2e9   : > { %637 = vrot.lane.b32.xlu1 %v2511_v38, %s2302_s27 }
 0x2ed   : > { %715 = vrot.lane.b32.xlu1 %v2490_v17, %s2303_s8 }
 0x2f1   : > { %v2184_v39 = vpop.eup %2183  ;;  %713 = vrot.lane.b32.xlu1 %v2496_v22, %s2304_s11 }
 0x2f2   : > { %v631_v40 = vsel %vm549_vm3, %v2184_v39, 0.0 }
 0x2f3   : > { %632 = vadd.xlane.f32.xlu0 %v631_v40 }
 0x35b   : > { %v638_v41 = vpop.permute.xlu1 %637 }
 0x35c   : > { %1961 = vmatpush3.msra.mxu0 %v638_v41 }
 0x35d   : > { %1965 = vmatprep.subr.mxu0 %v2299_v8 }
 0x35f   : > { %v716_v44 = vpop.permute.xlu1 %715 }
 0x363   : > { %v714_v46 = vpop.permute.xlu1 %713 }
 0x380   : > { %v633_v42 = vpop.xlane.xlu0 %632 }
 0x381   : > { %2185 = vrcp.f32 %v633_v42 }
 0x38b   : > { %v2186_v43 = vpop.eup %2185 }
 0x38c   : > { %v635_v45 = vmul.f32 %v2186_v43, %v2184_v39  ;;  %v415_v43 = vld [vmem:[%s2441_s29 + $0x18] sm:$0xff] }
 0x38e   : > { %1963 = vmatmul.mubr.msk.f32.vlgmr.msra.gmra.mrb[4].mxu0 %vm549_vm3, %v635_v45 }
 0x38f   : > { %1966 = vmatpush3.xpose.msk.msra.mxu0 %vm549_vm3, %v716_v44  ;;  %1967 = vmatprep.mubr.msk.f32.mxu0 %vm2298_vm1, %v2299_v8 }
 0x390   : > { %1970 = vmatprep.subr.mxu0 %v2299_v8 }
 0x392   : > { %1968 = vmatmul.mubr.msk.f32.vlgmr.msra.gmra.mrb[6].mxu0 %vm549_vm3, %v714_v46 }
 0x393   : > { %1972 = vmatprep.mubr.msk.f32.mxu0 %vm2298_vm1, %v2299_v8 }
 0x461   : > { %v709_v48 = vpop.f32.mrb[4].mxu0 }
 0x462   : > { %v1964_v49 = vpop.f32.mrb[5].mxu0  ;;  %1983 = vmatmul.mubr.msk.f32.vlgmr.msra.gmra.mrb[0].mxu1 %vm549_vm3, %v709_v48 }
 0x463   : > { %1992 = vmatprep.mubr.msk.f32.mxu1 %vm2298_vm1, %v2299_v8 }
 0x465   : > { %v787_v50 = vpop.f32.mrb[6].mxu0 }
 0x466   : > { %v788_v51 = vadd.f32 %v787_v50, %v2505_v27  ;;  %v1969_v52 = vpop.f32.mrb[7].mxu0 }
 0x467   : > { %v417_v52 = vld [vmem:[%s2446_s14 + $0x8] sm:$0xff] }
 0x468   : > { %v791_v53 = vsel %vm549_vm3, %v788_v51, -inf }
 0x469   : > { %792 = vmax.xlane.f32.xlu1 %v791_v53 }
 0x4f6   : > { %v793_v54 = vpop.xlane.xlu1 %792 }
 0x4f7   : > { %v794_v55 = vsub.f32 %v788_v51, %v793_v54  ;;  %v416_v51 = vld [vmem:[%s2446_s14] sm:$0xff]  ;;  %v418_v54 = vld [vmem:[%s2446_s14 + $0x10] sm:$0xff] }
 0x4f8   : > { %v2068_v53 = vpack.c.bf16 %v417_v52, %v416_v51 }
 0x4f9   : > { %v795_v56 = vmul.f32 1.442695, %v794_v55  ;;  %v419_v55 = vld [vmem:[%s2446_s14 + $0x18] sm:$0xff] }
 0x4fb   : > { %2187 = vpow2.f32 %v795_v56  ;;  %v2071_v56 = vpack.c.bf16 %v419_v55, %v418_v54 }
 0x505   : > { %v2188_v57 = vpop.eup %2187 }
 0x506   : > { %v797_v58 = vsel %vm549_vm3, %v2188_v57, 0.0 }
 0x507   : > { %798 = vadd.xlane.f32.xlu0 %v797_v58  ;;  %v421_v58 = vld [vmem:[%s2452_s22 + $0x8] sm:$0xff] }
 0x51d   : > { %802 = vrot.lane.b32.xlu0 %v2511_v38, %s2305_s17 }
 0x521   : > { %1026 = vrot.lane.b32.xlu0 %v2490_v17, %s2306_s19 }
 0x525   : > { %1024 = vrot.lane.b32.xlu0 %v2496_v22, %s2307_s10 }
 0x535   : > { %v1020_v59 = vpop.f32.mrb[0].mxu1 }
 0x536   : > { %v1984_v60 = vpop.f32.mrb[1].mxu1 }
 0x594   : > { %v799_v61 = vpop.xlane.xlu0 %798 }
 0x595   : > { %2189 = vrcp.f32 %v799_v61  ;;  %v1510_v61 = vsub.s32 4, %v2471_v9 }
 0x598   : > { %v803_v62 = vpop.permute.xlu0 %802 }
 0x599   : > { %1971 = vmatpush3.msra.mxu0 %v803_v62 }
 0x59a   : > { %1975 = vmatprep.subr.mxu0 %v2299_v8 }
 0x59c   : > { %v1027_v2 = vpop.permute.xlu0 %1026 }
 0x59f   : > { %v2190_v63 = vpop.eup %2189 }
 0x5a0   : > { %v801_v0 = vmul.f32 %v2190_v63, %v2188_v57  ;;  %v1025_v6 = vpop.permute.xlu0 %1024  ;;  %v420_v57 = vld [vmem:[%s2452_s22] sm:$0xff] }
 0x5a2   : > { %1973 = vmatmul.mubr.msk.f32.vlgmr.msra.gmra.mrb[8].mxu0 %vm549_vm3, %v801_v0  ;;  %v1515_v0 = vsub.s32 5, %v2471_v9 }
 0x5a3   : > { %1976 = vmatpush3.msra.mxu0 %v413_v1  ;;  %1977 = vmatprep.mubr.msk.f32.mxu0 %vm2298_vm1, %v2299_v8 }
 0x5a4   : > { %1985 = vmatprep.subr.mxu0 %v2299_v8 }
 0x675   : > { %v874_v3 = vpop.f32.mrb[8].mxu0 }
 0x676   : > { %v1974_v4 = vpop.f32.mrb[9].mxu0  ;;  %1978 = vmatmul.mubr.msk.f32.vlgmr.msra.gmra.mrb[10].mxu0 %vm549_vm3, %v874_v3  ;;  %v1511_v3 = vrot.slane %v2477_v11, %v1510_v61 }
 0x677   : > { %1986 = vmatpush3.xpose.msk.msra.mxu0 %vm549_vm3, %v1027_v2  ;;  %1987 = vmatprep.mubr.msk.f32.mxu0 %vm2298_vm1, %v2299_v8 }
 0x678   : > { %1995 = vmatprep.subr.mxu0 %v2299_v8 }
 0x67a   : > { %1988 = vmatmul.mubr.msk.f32.vlgmr.msra.gmra.mrb[12].mxu0 %vm549_vm3, %v1025_v6  ;;  %v1516_v6 = vrot.slane %v2477_v11, %v1515_v0 }
 0x67b   : > { %1997 = vmatprep.mubr.msk.f32.mxu0 %vm2298_vm1, %v2299_v8  ;;  %1996 = vmatpush3.msra.mxu0 %v414_v30 }
 0x67c   : > { %2005 = vmatprep.subr.mxu0 %v2299_v8 }
 0x749   : > { %v947_v7 = vpop.f32.mrb[10].mxu0 }
 0x74a   : > { %v1021_v10 = vadd.f32 %v1020_v59, %v947_v7  ;;  %v1979_v12 = vpop.f32.mrb[11].mxu0  ;;  %v2074_v59 = vpack.c.bf16 %v421_v58, %v420_v57 }
 0x74b   : > { %v422_v12 = vld [vmem:[%s2452_s22 + $0x10] sm:$0xff] }
 0x74d   : > { %v1098_v13 = vpop.f32.mrb[12].mxu0 }
 0x74e   : > { %v1099_v15 = vadd.f32 %v1098_v13, %v2505_v27  ;;  %v1989_v16 = vpop.f32.mrb[13].mxu0  ;;  %v423_v13 = vld [vmem:[%s2452_s22 + $0x18] sm:$0xff] }
 0x74f   : > { %v424_v16 = vld [vmem:[%s2452_s22 + $0x20] sm:$0xff] }
 0x750   : > { %v1102_v18 = vsel %vm549_vm3, %v1099_v15, -inf }
 0x751   : > { %1103 = vmax.xlane.f32.xlu1 %v1102_v18  ;;  %v425_v18 = vld [vmem:[%s2452_s22 + $0x28] sm:$0xff] }
 0x762   : > { %1113 = vrot.lane.b32.xlu1 %v2511_v38, %s2308_s15 }
 0x766   : > { %1265 = vrot.lane.b32.xlu1 %v2490_v17, %s2309_s20 }
 0x76a   : > { %1263 = vrot.lane.b32.xlu1 %v2496_v22, %s2310_s23 }
 0x7de   : > { %v1104_v19 = vpop.xlane.xlu1 %1103 }
 0x7df   : > { %v1105_v20 = vsub.f32 %v1099_v15, %v1104_v19  ;;  %v2077_v15 = vpack.c.bf16 %v423_v13, %v422_v12  ;;  %v426_v19 = vld [vmem:[%s2452_s22 + $0x30] sm:$0xff] }
 0x7e1   : > { %v1106_v21 = vmul.f32 1.442695, %v1105_v20  ;;  %v427_v20 = vld [vmem:[%s2452_s22 + $0x38] sm:$0xff] }
 0x7e2   : > { %v1114_v23 = vpop.permute.xlu1 %1113 }
 0x7e3   : > { %2191 = vpow2.f32 %v1106_v21  ;;  %1991 = vmatpush3.msra.mxu1 %v1114_v23  ;;  %v2083_v21 = vpack.c.bf16 %v427_v20, %v426_v19  ;;  %v428_v23 = vld [vmem:[%s2452_s22 + $0x40] sm:$0xff] }
 0x7e4   : > { %2000 = vmatprep.subr.mxu1 %v2299_v8 }
 0x7e6   : > { %v1266_v17 = vpop.permute.xlu1 %1265 }
 0x7ea   : > { %v1264_v22 = vpop.permute.xlu1 %1263 }
 0x7ed   : > { %v2192_v24 = vpop.eup %2191 }
 0x7ee   : > { %v1108_v25 = vsel %vm549_vm3, %v2192_v24, 0.0 }
 0x7ef   : > { %1109 = vadd.xlane.f32.xlu0 %v1108_v25 }
 0x87c   : > { %v1110_v26 = vpop.xlane.xlu0 %1109 }
 0x87d   : > { %2193 = vrcp.f32 %v1110_v26  ;;  %v430_v26 = vld [vmem:[%s2452_s22 + $0x50] sm:$0xff] }
 0x887   : > { %v2194_v28 = vpop.eup %2193 }
 0x888   : > { %v1112_v29 = vmul.f32 %v2194_v28, %v2192_v24  ;;  %v429_v24 = vld [vmem:[%s2452_s22 + $0x48] sm:$0xff]  ;;  %v431_v28 = vld [vmem:[%s2452_s22 + $0x58] sm:$0xff] }
 0x889   : > { %v2086_v25 = vpack.c.bf16 %v429_v24, %v428_v23 }
 0x88a   : > { %1993 = vmatmul.mubr.msk.f32.vlgmr.msra.gmra.mrb[2].mxu1 %vm549_vm3, %v1112_v29  ;;  %v432_v29 = vld [vmem:[%s2452_s22 + $0x60] sm:$0xff] }
 0x88b   : > { %2001 = vmatpush3.xpose.msk.msra.mxu1 %vm549_vm3, %v1266_v17  ;;  %2002 = vmatprep.mubr.msk.f32.mxu1 %vm2298_vm1, %v2299_v8  ;;  %v2089_v17 = vpack.c.bf16 %v431_v28, %v430_v26 }
 0x88c   : > { %2010 = vmatprep.subr.mxu1 %v2299_v8 }
 0x88e   : > { %2003 = vmatmul.mubr.msk.f32.vlgmr.msra.gmra.mrb[4].mxu1 %vm549_vm3, %v1264_v22  ;;  %v433_v22 = vld [vmem:[%s2452_s22 + $0x68] sm:$0xff] }
 0x88f   : > { %2012 = vmatprep.mubr.msk.f32.mxu1 %vm2298_vm1, %v2299_v8  ;;  %2011 = vmatpush3.msra.mxu1 %v415_v43  ;;  %v2092_v30 = vpack.c.bf16 %v433_v22, %v432_v29 }
 0x890   : > { %2073 = vmatprep.subr.bf16.mxu1 %v2297_v5 }
 0x95d   : > { %v1185_v31 = vpop.f32.mrb[2].mxu1 }
 0x95e   : > { %v1994_v32 = vpop.f32.mrb[3].mxu1  ;;  %1998 = vmatmul.mubr.msk.f32.vlgmr.msra.gmra.mrb[14].mxu0 %vm549_vm3, %v1185_v31  ;;  %v434_v31 = vld [vmem:[%s2452_s22 + $0x70] sm:$0xff] }
 0x95f   : > { %2007 = vmatprep.mubr.msk.f32.mxu0 %vm2298_vm1, %v2299_v8  ;;  %v435_v32 = vld [vmem:[%s2452_s22 + $0x78] sm:$0xff] }
 0x961   : > { %v1337_v33 = vpop.f32.mrb[4].mxu1 }
 0x962   : > { %v1338_v34 = vadd.f32 %v1337_v33, %v2505_v27  ;;  %v2004_v35 = vpop.f32.mrb[5].mxu1  ;;  %v2095_v33 = vpack.c.bf16 %v435_v32, %v434_v31 }
 0x964   : > { %v1341_v36 = vsel %vm549_vm3, %v1338_v34, -inf }
 0x965   : > { %1342 = vmax.xlane.f32.xlu1 %v1341_v36 }
 0x9f2   : > { %v1343_v37 = vpop.xlane.xlu1 %1342 }
 0x9f3   : > { %v1344_v39 = vsub.f32 %v1338_v34, %v1343_v37  ;;  %v1881_v34 = vld [vmem:[%s399_s0] ss:$0 sm:$0xff]  ;;  %s1885_s0 = sshll.u32 %s2283_s28, 7  ;;  %s2312_s28 = smov [#allocation2]  }
 0x9f4   : > { %s2635_s30 = scalar_lea.hbm %s2699_s7, %s1885_s0 }
 0x9f5   : > { %v1345_v40 = vmul.f32 1.442695, %v1344_v39 }
 0x9f7   : > { %2195 = vpow2.f32 %v1345_v40 }
 0xa01   : > { %v2196_v41 = vpop.eup %2195 }
 0xa02   : > { %v1347_v42 = vsel %vm549_vm3, %v2196_v41, 0.0 }
 0xa03   : > { %1348 = vadd.xlane.f32.xlu0 %v1347_v42 }
 0xa19   : > { %1352 = vrot.lane.b32.xlu0 %v2511_v38, %s2311_s9 }
 0xa31   : > { %v1258_v27 = vpop.f32.mrb[14].mxu0 }
 0xa32   : > { %v1262_v44 = vadd.f32 %v1258_v27, %v1021_v10  ;;  %v1999_v45 = vpop.f32.mrb[15].mxu0 }
 0xa90   : > { %v1349_v46 = vpop.xlane.xlu0 %1348 }
 0xa91   : > { %2197 = vrcp.f32 %v1349_v46  ;;  %v1608_v46 = vsub.s32 6, %v2471_v9 }
 0xa94   : > { %v1353_v47 = vpop.permute.xlu0 %1352 }
 0xa95   : > { %2006 = vmatpush3.msra.mxu0 %v1353_v47  ;;  %v1609_v47 = vrot.slane %v2477_v11, %v1608_v46 }
 0xa96   : > { %2067 = vmatprep.subr.bf16.mxu0 %v2297_v5 }
 0xa9b   : > { %v2198_v48 = vpop.eup %2197 }
 0xa9c   : > { %v1351_v49 = vmul.f32 %v2198_v48, %v2196_v41  ;;  %v1683_v48 = vsub.s32 7, %v2471_v9 }
 0xa9e   : > { %2008 = vmatmul.mubr.msk.f32.vlgmr.msra.gmra.mrb[16].mxu0 %vm549_vm3, %v1351_v49 }
 0xa9f   : > { %2023 = vmatprep.mubr.msk.f32.mxu0 %vm2298_vm1, %v2299_v8  ;;  %2069 = vmatpush3.bf16.msra.mxu0 %v2068_v53  ;;  %v1883_v53 = vld [vmem:[%s2458_s16 + $0x8] ss:$0 sm:$0xff]  ;;  %s2205_s16 = sshll.u32 %s2312_s28, 4  ;;  %s2206_s16 = int_to_ptr.vmem [resolvable:$false] %s2205_s16 }
 0xaa0   : > { %2070 = vmatprep.subr.bf16.mxu0 %v2297_v5  ;;  %s2207_s27 = scalar_lea.vmem %s2206_s16, 256  ;;  %p2208_p5 = scmp.lt.s32.totalorder %s2637_s21, %s2206_s16 }
 0xaa1   : > { %p2209_p6 = scmp.lt.s32.totalorder %s2207_s27, %s2201_s26 }
 0xaa3   : > { %2072 = vmatpush3.bf16.msra.mxu0 %v2071_v56  ;;  %p2210_p7 = por %p2209_p6, %p2208_p5 }
 0xaa5   : > { %p2211_p8 = pnand %p2210_p7, %p2204_p4 }
 0xb71   : > { %v1424_v38 = vpop.f32.mrb[16].mxu0 }
 0xb72   : > { %v2009_v50 = vpop.f32.mrb[17].mxu0  ;;  %2013 = vmatmul.mubr.msk.f32.vlgmr.msra.gmra.mrb[6].mxu1 %vm549_vm3, %v1424_v38 }
 0xb73   : > { %2058 = vmatprep.mubr.msk.f32.mxu1 %vm2298_vm1, %v2299_v8  ;;  %2075 = vmatpush3.bf16.msra.mxu1 %v2074_v59  ;;  %v1504_v8 = vsub.s32 3, %v2471_v9  ;;  %v1684_v50 = vrot.slane %v2477_v11, %v1683_v48 }
 0xb74   : > { %2076 = vmatprep.subr.bf16.mxu1 %v2297_v5 }
 0xb75   : > { %v1505_v60 = vrot.slane %v2477_v11, %v1504_v8 }
 0xb77   : > { %2078 = vmatpush3.bf16.msra.mxu1 %v2077_v15 }
 0xb78   : > { %2079 = vmatprep.subr.bf16.mxu1 %v2297_v5 }
 0xc45   : > { %v1497_v62 = vpop.f32.mrb[6].mxu1 }
 0xc46   : > { %v1501_v63 = vadd.f32 %v1497_v62, %v1262_v44  ;;  %v2014_v1 = vpop.f32.mrb[7].mxu1 }
 0xc48   : > { %v1506_v2 = vadd.f32 %v1505_v60, %v1501_v63 }
 0xc4a   : > { %v1507_v4 = vadd.f32 %v1506_v2, %v2483_v14  ;;  %v2080_v14 = vpack.c.bf16 %v425_v18, %v424_v16 }
 0xc4c   : > { %v1512_v7 = vmul.f32 %v1511_v3, %v1507_v4  ;;  %2081 = vmatpush3.bf16.msra.mxu1 %v2080_v14 }
 0xc4d   : > { %2082 = vmatprep.subr.bf16.mxu1 %v2297_v5 }
 0xc4e   : > { %v1517_v10 = vadd.f32 %v1516_v6, %v1512_v7 }
 0xc50   : > { %2024 = vmatmul.mubr.msk.f32.vlgmr.msra.gmra.mrb[18].mxu0 %vm439_vm2, %v1517_v10  ;;  %2084 = vmatpush3.bf16.msra.mxu1 %v2083_v21 }
 0xc51   : > { %2085 = vmatprep.subr.bf16.mxu1 %v2297_v5 }
 0xc54   : > { %2087 = vmatpush3.bf16.msra.mxu1 %v2086_v25 }
 0xc55   : > { %2088 = vmatprep.subr.bf16.mxu1 %v2297_v5 }
 0xc58   : > { %2090 = vmatpush3.bf16.msra.mxu1 %v2089_v17 }
 0xc59   : > { %2091 = vmatprep.subr.bf16.mxu1 %v2297_v5 }
 0xc5c   : > { %2093 = vmatpush3.bf16.msra.mxu1 %v2092_v30 }
 0xc5d   : > { %2094 = vmatprep.subr.bf16.mxu1 %v2297_v5 }
 0xc60   : > { %2096 = vmatpush3.bf16.msra.mxu1 %v2095_v33 }
 0xd23   : > { %v1593_v35 = vpop.f32.mrb[18].mxu0 }
 0xd24   : > { %v1594_v36 = vadd.f32 %v1881_v34, %v1593_v35  ;;  %v2025_v37 = vpop.f32.mrb[19].mxu0 }
 0xd26   : > { %v1598_v39 = vmul.f32 %v1594_v36, %v1594_v36  ;;  %v1597_v5 = vmul.f32 0.5, %v1594_v36 }
 0xd28   : > { %v1599_v40 = vmul.f32 %v1598_v39, %v1594_v36 }
 0xd2a   : > { %v1600_v41 = vmul.f32 0.044715, %v1599_v40 }
 0xd2c   : > { %v1601_v42 = vadd.f32 %v1600_v41, %v1594_v36 }
 0xd2e   : > { %v1602_v43 = vmul.f32 0.7978846, %v1601_v42 }
 0xd30   : > { %2199 = vtanh.f32 %v1602_v43 }
 0xd3a   : > { %v2200_v27 = vpop.eup %2199 }
 0xd3b   : > { %v1604_v44 = vadd.f32 1.0, %v2200_v27 }
 0xd3d   : > { %v1605_v45 = vmul.f32 %v1604_v44, %v1597_v5 }
 0xd3f   : > { %2059 = vmatmul.mubr.f32.vlgmr.msra.gmra.mrb[8].mxu1 %v1605_v45 }
 0xe12   : > { %v1676_v49 = vpop.f32.mrb[8].mxu1 }
 0xe13   : > { %v1677_v38 = vadd.f32 %v1676_v49, %v1609_v47  ;;  %v2060_v51 = vpop.f32.mrb[9].mxu1 }
 0xe15   : > { %v1680_v52 = vadd.f32 %v1677_v38, %v1517_v10 }
 0xe17   : > { %v1685_v54 = vmul.f32 %v1684_v50, %v1680_v52 }
 0xe19   : > { %v1690_v55 = vadd.f32 %v1883_v53, %v1685_v54 }
 0xe1b   : > { %1691 = vst.msk [vmem:[%s2464_s1] sm:$0xff] %vm439_vm2, %v1690_v55 }
 0xe1c   : > { %2214 = shalt.err (!%p2211_p8)
}
 0xe1d   : > { %s2215_s1 = scalar_lea.hbm %s2635_s30, 128  ;;  %s2219_s17 = scalar_lea.hbm %s2699_s7, 256 }
 0xe1e   : > { %p2216_p10 = scmp.ne.s32.totalorder %s2635_s30, %s2215_s1  ;;  %p2220_p13 = scmp.lt.u32.totalorder %s2635_s30, %s2699_s7 }
 0xe1f   : > { %p2221_p0 = scmp.lt.u32.totalorder %s2219_s17, %s2215_s1  ;;  %p2223_p2 = scmp.lt.u32.totalorder %s2215_s1, %s2635_s30 }
 0xe20   : > { %p2217_p11 = pnand %p2216_p10, %p2402_p3 }
 0xe21   : > { %p2222_p1 = por %p2221_p0, %p2220_p13 }
 0xe22   : > { %p2218_p12 = pneg %p2217_p11 }
 0xe23   : > { %p2224_p4 = por %p2223_p2, %p2222_p1 }
 0xe25   : > { %p2225_p5 = pnand %p2224_p4, %p2218_p12 }
 0xe27   : > { %2228 = shalt.err (!%p2225_p5)
}
 0xe28   : > { %2097 = dma.vmem_to_hbm [thread:$0]  (%p2402_p3), %s2637_s21, 128, %s2635_s30, %s1693_s24  }
 0xe29 PF: > { %s2725_s15 = sld [smem:[#allocation9_spill]]  ;;  %s2726_s20 = sld [smem:[#allocation5_spill]] }
 0xe2f   : > { %p2103_p6 = scmp.ge.s32.totalorder %s2725_s15, 2  ;;  %s1718_s9 = sand.u32 1, %s2726_s20  }
 0xe30   : > { %s1719_s29 = scalar_lea.sflag [#allocation3], %s1718_s9 }
 0xe31   : > { %p2100_p7 = pnand %p2103_p6, %p2412_p9 }
 0xe33   : > { %2262 = dma.done.wait (!%p2100_p7), %s1719_s29, 128  }
 0xe34   : > { %2264 = vsyncadd (!%p2100_p7), %s1719_s29, 4294967168  ;;  %s20_s8 = sadd.s32 1, %s2725_s15   ;;  %s2728_s14 = sld [smem:[#allocation6_spill]] }
 0xe35   : > { %p17_p8 = scmp.ge.s32.totalorder %s20_s8, 6   ;;  %s2729_s26 = sld [smem:[#allocation13_spill]] }
 0xe36   : > { %s2730_s27 = sld [smem:[#allocation7_spill]]  ;;  %s2731_s28 = sld [smem:[#allocation8_spill]] }
 0xe37   : > { %s2732_s29 = sld [smem:[#allocation10_spill]]  ;;  %s2733_s30 = sld [smem:[#allocation11_spill]] }
 0xe38   : > { %s2734_s24 = smov %s2271_s25  ;;  %19 = sbr.rel (!%p17_p8) target bundleno = 8 (0x8), region = 105 }
 0xe3a   : > { %s2735_s25 = smov %s2728_s14 }
 0xe3f   :  { %1724 = vsyncpa [#allocation3], 1 }
 0xe40   :  { %1726 = vsyncpa [#allocation3 + $0x1], 1 }

</bundles_post_ra>
